<compile_context>
chip_gen: v7x
topology: tpu7x:2x2x1
jax: 0.10.0
libtpu: 0.0.40
codegen_flags: <defaults>
</compile_context>

<pallas_src>
import math

import jax
import jax.numpy as jnp
from jax.experimental import pallas as pl
from jax.experimental.pallas import tpu as pltpu


def _bernoulli_nll_kernel(x_ref, w_ref, b_ref, t_ref, o_ref):
    # x_ref: (tm_p, pack*d_inp)   w_ref: (pack*d_inp, pack*d_tgt)
    # b_ref: (1, pack*d_tgt)      t_ref / o_ref: (tm_p, pack*d_tgt)
    logit = jnp.dot(x_ref[...], w_ref[...],
                    preferred_element_type=jnp.float32) + b_ref[...]
    t = t_ref[...].astype(jnp.float32)
    # Numerically-stable BCE-with-logits, elementwise (reduction='none').
    nll = (jnp.maximum(logit, 0.0)
           - logit * t
           + jnp.log1p(jnp.exp(-jnp.abs(logit))))
    o_ref[...] = nll.astype(o_ref.dtype)


def pack_bernoulli_params(weight, bias, *, weight_dtype=None):
    """Pre-pack the Linear params (call once per weight update, not per step).

    Builds the lane-packing block-diagonal weight kron(I_pack_max, W^T) and the
    tiled bias at the maximum pack factor (128 // d_tgt).  A smaller pack (for
    batch sizes not divisible by pack_max) is just the leading block of these,
    so `bernoulli_criterion` slices instead of rebuilding.

    `weight_dtype=jnp.bfloat16` is recommended on v5e (keeps the 8x-inflated
    kron matmul off the MXU critical path); leave None for exact f32.
    """
    d_tgt, d_inp = weight.shape
    pack_max = 128 // d_tgt if (d_tgt <= 128 and 128 % d_tgt == 0) else 1
    wt = jnp.swapaxes(weight, 0, 1)                      # (d_inp, d_tgt)
    if weight_dtype is not None:
        wt = wt.astype(weight_dtype)
    if pack_max > 1:
        w_k = jnp.kron(jnp.eye(pack_max, dtype=wt.dtype), wt)
        b_k = jnp.tile(bias.astype(jnp.float32), pack_max)
        b_k = b_k.reshape(1, pack_max * d_tgt)
    else:
        w_k = wt
        b_k = bias.astype(jnp.float32).reshape(1, d_tgt)
    return {"w": w_k, "b": b_k, "pack_max": pack_max,
            "d_tgt": d_tgt, "d_inp": d_inp}


def bernoulli_criterion(inp, target, weight=None, bias=None, *, params=None,
                        block_m=16384, out_dtype=jnp.float32,
                        compute_dtype=None):
    """inp: (..., d_inp), target: (..., d_tgt) -> per-element NLL (..., d_tgt)."""
    if params is None:
        params = pack_bernoulli_params(weight, bias, weight_dtype=compute_dtype)
    d_tgt, d_inp = params["d_tgt"], params["d_inp"]
    pack_max = params["pack_max"]

    lead_shape = inp.shape[:-1]
    m = math.prod(lead_shape) if lead_shape else 1

    # Largest power-of-two pack (<= pack_max = 128 // d_tgt) that divides m:
    # reshape-based lane packing then needs NO padding copy of the big arrays.
    # pack == 1 (odd m, or 128 % d_tgt != 0) is a known perf cliff
    # (<128-lane output -> masked partial stores), but still correct.
    pack = pack_max
    while pack > 1 and m % pack != 0:
        pack //= 2

    k_in, k_out = pack * d_inp, pack * d_tgt
    if pack == pack_max:
        w_k, b_k = params["w"], params["b"]
    else:
        # kron(I_pack, W^T) is exactly the leading block of kron(I_pack_max, W^T).
        w_k = params["w"][:k_in, :k_out]
        b_k = params["b"][:, :k_out]

    if compute_dtype is not None:
        inp = inp.astype(compute_dtype)

    m_packed = m // pack
    # Free row-major reshapes (views on the same HBM layout, no data movement).
    x2 = inp.reshape(m_packed, k_in)
    t2 = target.reshape(m_packed, k_out)

    # --- Tile the packed-row axis -------------------------------------------
    # Big tiles amortize the per-grid-step overhead, but keep >= 4 grid steps
    # when the problem is large enough so the "parallel" axis can shard across
    # both v7x TensorCores and the DMA pipeline stays busy.
    if m_packed <= 8:
        tm_p = m_packed                       # single block == full (tiny) dim
    else:
        tm_p_cap = max(8, (block_m // pack) // 8 * 8)
        min_steps = min(4, pl.cdiv(m_packed, 8))
        n_steps = max(pl.cdiv(m_packed, tm_p_cap), min_steps)
        tm_p = min(tm_p_cap, pl.cdiv(pl.cdiv(m_packed, n_steps), 8) * 8)
    grid_m = pl.cdiv(m_packed, tm_p)
    # Ragged tail (m_packed % tm_p != 0) is handled by Pallas' non-divisible
    # grid support: the last block's OOB reads never reach HBM via the masked
    # output writeback.  No wrapper-side jnp.pad (full extra HBM pass) needed.

    x_b = jnp.dtype(x2.dtype).itemsize
    t_b = jnp.dtype(t2.dtype).itemsize
    w_b = jnp.dtype(w_k.dtype).itemsize
    o_b = jnp.dtype(out_dtype).itemsize

    # Double-buffered per-tile VMEM footprint; 2x headroom, capped at v7x's
    # 64 MiB physical VMEM.  Explicit limit keeps large block_m safe on v5e
    # (16 MiB default scoped VMEM).
    vmem_need = (2 * tm_p * (k_in * x_b + k_out * (t_b + o_b))
                 + 2 * (k_in * k_out * w_b + k_out * 4))
    vmem_limit = int(min(64 * 1024 * 1024,
                         max(2 * vmem_need, 16 * 1024 * 1024)))

    cost = pl.CostEstimate(
        flops=2 * m_packed * k_in * k_out + 5 * m * d_tgt,
        transcendentals=2 * m * d_tgt,                     # exp + log1p per elem
        bytes_accessed=(m_packed * (k_in * x_b + k_out * (t_b + o_b))
                        + k_in * k_out * w_b + k_out * 4),
    )

    out = pl.pallas_call(
        _bernoulli_nll_kernel,
        out_shape=jax.ShapeDtypeStruct((m_packed, k_out), out_dtype),
        grid_spec=pltpu.PrefetchScalarGridSpec(
            num_scalar_prefetch=0,
            grid=(grid_m,),
            in_specs=[
                pl.BlockSpec((tm_p, k_in), lambda i: (i, 0)),    # x tile
                pl.BlockSpec((k_in, k_out), lambda i: (0, 0)),   # packed weight
                pl.BlockSpec((1, k_out), lambda i: (0, 0)),      # packed bias
                pl.BlockSpec((tm_p, k_out), lambda i: (i, 0)),   # target tile
            ],
            out_specs=pl.BlockSpec((tm_p, k_out), lambda i: (i, 0)),
        ),
        compiler_params=pltpu.CompilerParams(
            # Disjoint M tiles -> safe to shard across TensorCores (v7x).
            dimension_semantics=("parallel",),
            vmem_limit_bytes=vmem_limit),
        cost_estimate=cost,
    )(x2, w_k, b_k, t2)

    out = out.reshape(m, d_tgt)
    return out.reshape(*lead_shape, d_tgt)


def _reference(inp, target, weight, bias):
    logit = jnp.einsum('id,...d->...i', weight, inp,
                       precision=jax.lax.Precision.HIGHEST) + bias
    return (jnp.maximum(logit, 0.0)
            - logit * target
            + jnp.log1p(jnp.exp(-jnp.abs(logit))))


if __name__ == "__main__":
    # Small shapes consistent with the module: batch=2, seq=8, d_inp=32, d_tgt=16.
    batch, seq, d_inp, d_tgt = 2, 8, 32, 16

    key = jax.random.PRNGKey(0)
    k_w, k_x, k_t = jax.random.split(key, 3)

    # Deterministic init matching nn.init.kaiming_uniform_(a=sqrt(5)):
    # bound = 1 / sqrt(fan_in); bias zeroed.
    bound = 1.0 / math.sqrt(d_inp)
    logit_weight = jax.random.uniform(
        k_w, (d_tgt, d_inp), dtype=jnp.float32, minval=-bound, maxval=bound)
    logit_bias = jnp.zeros((d_tgt,), dtype=jnp.float32)

    inp = jax.random.normal(k_x, (batch, seq, d_inp), dtype=jnp.float32)
    # Bernoulli targets in {0, 1}: bf16 is exact and halves the target stream.
    target = jax.random.bernoulli(
        k_t, 0.5, (batch, seq, d_tgt)).astype(jnp.bfloat16)

    # Weight prep hoisted out of the per-call path (once per weight update).
    params = pack_bernoulli_params(logit_weight, logit_bias)

    nll = bernoulli_criterion(inp, target, params=params)
    nll = jax.block_until_ready(nll)

    ref = _reference(inp, target.astype(jnp.float32), logit_weight, logit_bias)
    assert nll.shape == (batch, seq, d_tgt)
    assert jnp.allclose(nll, ref, atol=1e-5, rtol=1e-5), "mismatch vs reference"

    print("KERNEL_OK")
</pallas_src>

<mosaic_0001>
module attributes {stable_mosaic.version = 11 : i64} {
  func.func @_bernoulli_nll_kernel(%arg0: i32, %arg1: memref<2x256xf32, #tpu.memory_space<vmem>>, %arg2: memref<256x128xf32, #tpu.memory_space<vmem>>, %arg3: memref<1x128xf32, #tpu.memory_space<vmem>>, %arg4: memref<2x128xbf16, #tpu.memory_space<vmem>>, %arg5: memref<2x128xf32, #tpu.memory_space<vmem>>) attributes {dimension_semantics = [#tpu.dimension_semantics<parallel>], iteration_bounds = array<i64: 1>, scalar_prefetch = 0 : i64, scratch_operands = 0 : i64, tpu.core_type = #tpu.core_type<tc>, window_params = [{transform_indices = @transform_0, window_bounds = array<i64: 2, 256>}, {pipeline_mode = #tpu.pipeline_mode<synchronous>, transform_indices = @transform_1, window_bounds = array<i64: 256, 128>}, {pipeline_mode = #tpu.pipeline_mode<synchronous>, transform_indices = @transform_2, window_bounds = array<i64: 1, 128>}, {transform_indices = @transform_3, window_bounds = array<i64: 2, 128>}, {transform_indices = @transform_4, window_bounds = array<i64: 2, 128>}]} {
    %c0 = arith.constant 0 : index
    %c0_0 = arith.constant 0 : index
    %0 = vector.load %arg1[%c0, %c0_0] : memref<2x256xf32, #tpu.memory_space<vmem>>, vector<2x256xf32>
    %c0_1 = arith.constant 0 : index
    %c0_2 = arith.constant 0 : index
    %1 = vector.load %arg2[%c0_1, %c0_2] : memref<256x128xf32, #tpu.memory_space<vmem>>, vector<256x128xf32>
    %cst = arith.constant dense<0.000000e+00> : vector<2x128xf32>
    %2 = tpu.matmul %0, %1, %cst {dimension_numbers = #tpu.dot_dimension_numbers<[1], [0], [0], [1], [0, 0, 1, 1], [], []>} : vector<2x256xf32>, vector<256x128xf32>, vector<2x128xf32> -> vector<2x128xf32>
    %c0_3 = arith.constant 0 : index
    %c0_4 = arith.constant 0 : index
    %3 = vector.load %arg3[%c0_3, %c0_4] : memref<1x128xf32, #tpu.memory_space<vmem>>, vector<1x128xf32>
    %4 = vector.broadcast %3 : vector<1x128xf32> to vector<2x128xf32>
    %5 = arith.addf %2, %4 : vector<2x128xf32>
    %c0_5 = arith.constant 0 : index
    %c0_6 = arith.constant 0 : index
    %6 = vector.load %arg4[%c0_5, %c0_6] : memref<2x128xbf16, #tpu.memory_space<vmem>>, vector<2x128xbf16>
    %7 = arith.extf %6 : vector<2x128xbf16> to vector<2x128xf32>
    %cst_7 = arith.constant 0.000000e+00 : f32
    %8 = vector.broadcast %cst_7 : f32 to vector<2x128xf32>
    %9 = arith.maximumf %5, %8 : vector<2x128xf32>
    %10 = arith.mulf %5, %7 : vector<2x128xf32>
    %11 = arith.subf %9, %10 : vector<2x128xf32>
    %12 = math.absf %5 : vector<2x128xf32>
    %cst_8 = arith.constant 0.000000e+00 : f32
    %13 = vector.broadcast %cst_8 : f32 to vector<2x128xf32>
    %14 = arith.subf %13, %12 : vector<2x128xf32>
    %15 = math.exp %14 : vector<2x128xf32>
    %16 = math.log1p %15 : vector<2x128xf32>
    %17 = arith.addf %11, %16 : vector<2x128xf32>
    %c0_9 = arith.constant 0 : index
    %c0_10 = arith.constant 0 : index
    %18 = vector.load %arg5[%c0_9, %c0_10] : memref<2x128xf32, #tpu.memory_space<vmem>>, vector<2x128xf32>
    tpu.vector_store %arg5[%c0_9, %c0_10], %17 {strides = array<i32>} : memref<2x128xf32, #tpu.memory_space<vmem>>, vector<2x128xf32>,
    return
  }
  func.func @transform_0(%arg0: i32) -> (i32, i32) {
    %c0_i32 = arith.constant 0 : i32
    %c0_i32_0 = arith.constant 0 : i32
    return %arg0, %c0_i32 : i32, i32
  }
  func.func @transform_1(%arg0: i32) -> (i32, i32) {
    %c0_i32 = arith.constant 0 : i32
    %c0_i32_0 = arith.constant 0 : i32
    %c0_i32_1 = arith.constant 0 : i32
    return %c0_i32, %c0_i32_0 : i32, i32
  }
  func.func @transform_2(%arg0: i32) -> (i32, i32) {
    %c0_i32 = arith.constant 0 : i32
    %c0_i32_0 = arith.constant 0 : i32
    %c0_i32_1 = arith.constant 0 : i32
    return %c0_i32, %c0_i32_0 : i32, i32
  }
  func.func @transform_3(%arg0: i32) -> (i32, i32) {
    %c0_i32 = arith.constant 0 : i32
    %c0_i32_0 = arith.constant 0 : i32
    return %arg0, %c0_i32 : i32, i32
  }
  func.func @transform_4(%arg0: i32) -> (i32, i32) {
    %c0_i32 = arith.constant 0 : i32
    %c0_i32_0 = arith.constant 0 : i32
    return %arg0, %c0_i32 : i32, i32
  }
}

</mosaic_0001>

<bundles_post_ra>
// kernel: tpu_custom_call.1
= control target key start
LH: loop header
LB: loop body
LE: loop exit
PB: predicated region body
PF: predicated region fallthrough
CT: control target
= control target key end

     0   :  { %9 = vsyncpa [#allocation3], 0  ;;  %s430_s0 = inlined_call_operand.hbm [shape: f32[2,256], index: 0, kind: input, shape index: {}]   ;;  %s431_s1 = inlined_call_operand.hbm [shape: f32[256,128], index: 1, kind: input, shape index: {}]   ;;  %s432_s2 = inlined_call_operand.vmem [shape: f32[1,128], index: 2, kind: input, shape index: {}]   ;;  %s433_s3 = inlined_call_operand.vmem [shape: bf16[2,128], index: 3, kind: input, shape index: {}]   ;;  %s434_s4 = inlined_call_operand.hbm [shape: f32[2,128], index: 4, kind: output, shape index: {}]  }
   0x1   :  { %10 = vsyncpa [#allocation6], 0 }
   0x2   :  { %11 = vsyncpa [#allocation4], 0  ;;  %s351_s15 = smov [#allocation2]   ;;  %s352_s17 = smov [#allocation5]  }
   0x3   :  { %s18_s16 = sshll.u32 %s351_s15, 4  ;;  %s27_s18 = sshll.u32 %s352_s17, 4  ;;  %s19_s16 = int_to_ptr.vmem [resolvable:$true] %s18_s16  ;;  %s381_s18 = int_to_ptr.vmem [resolvable:$true] %s27_s18 }
   0x4   :  { %s279_s21 = scalar_lea.hbm %s430_s0, 64 }
   0x5   :  { %p280_p0 = scmp.ne.s32.totalorder %s430_s0, %s279_s21  ;;  %p283_p1 = scmp.lt.u32.totalorder %s279_s21, %s430_s0 }
   0x7   :  { %p285_p2 = pnand %p283_p1, %p280_p0 }
   0x9   :  { %288 = shalt.err (!%p285_p2)
}
   0xa   :  { %s289_s26 = scalar_lea.vmem %s19_s16, 64  ;;  %p294_p4 = scmp.lt.s32.totalorder %s19_s16, %s19_s16 }
   0xb   :  { %p290_p3 = scmp.ne.s32.totalorder %s19_s16, %s289_s26  ;;  %p295_p5 = scmp.lt.s32.totalorder %s289_s26, %s289_s26 }
   0xd   :  { %p296_p6 = por %p295_p5, %p294_p4 }
   0xf   :  { %p297_p7 = pnand %p296_p6, %p290_p3 }
  0x11   :  { %300 = shalt.err (!%p297_p7)
}
  0x12   :  { %21 = dma.hbm_to_vmem [thread:$0]  %s430_s0, 64, %s19_s16, [#allocation3]  }
  0x13   :  { %s301_s5 = scalar_lea.hbm %s431_s1, 4096 }
  0x14   :  { %p302_p8 = scmp.ne.s32.totalorder %s431_s1, %s301_s5  ;;  %p305_p9 = scmp.lt.u32.totalorder %s301_s5, %s431_s1 }
  0x16   :  { %p307_p10 = pnand %p305_p9, %p302_p8 }
  0x18   :  { %310 = shalt.err (!%p307_p10)
}
  0x19   :  { %s311_s10 = scalar_lea.vmem %s381_s18, 4096  ;;  %p316_p12 = scmp.lt.s32.totalorder %s381_s18, %s381_s18 }
  0x1a   :  { %p312_p11 = scmp.ne.s32.totalorder %s381_s18, %s311_s10  ;;  %p317_p13 = scmp.lt.s32.totalorder %s311_s10, %s311_s10 }
  0x1c   :  { %p318_p0 = por %p317_p13, %p316_p12 }
  0x1e   :  { %p319_p1 = pnand %p318_p0, %p312_p11 }
  0x20   :  { %322 = shalt.err (!%p319_p1)
}
  0x21   :  { %s353_s0 = smov 128   ;;  %s354_s11 = smov 8  }
  0x22   :  { %33 = dma.hbm_to_vmem [thread:$0]  %s431_s1, 4096, %s381_s18, [#allocation6], %s353_s0, %s353_s0, %s354_s11  }
  0x23   :  { %345 = dma.done.wait [#allocation3], 64  }
  0x24   :  { %346 = vsyncadd [#allocation3], 4294967232 }
  0x25   :  { %347 = dma.done.wait [#allocation6], 4096  }
  0x26   :  { %348 = vsyncadd [#allocation6], 4294963200  ;;  %v61_v0 = vld [vmem:[#allocation5 + $0x80] sm:$0xff]  ;;  %v62_v1 = vld [vmem:[#allocation5 + $0x88] sm:$0xff] }
  0x27   :  { %v45_v2 = vld [vmem:[#allocation5] sm:$0xff]  ;;  %v238_v3 = vpack.c.bf16 %v62_v1, %v61_v0  ;;  %v46_v4 = vld [vmem:[#allocation5 + $0x8] sm:$0xff]  ;;  %v63_v5 = vld [vmem:[#allocation5 + $0x90] sm:$0xff] }
  0x28   :  { %v64_v6 = vld [vmem:[#allocation5 + $0x98] sm:$0xff]  ;;  %v240_v7 = vpack.c.bf16 %v46_v4, %v45_v2  ;;  %v47_v9 = vld [vmem:[#allocation5 + $0x10] sm:$0xff]  ;;  %v65_v11 = vld [vmem:[#allocation5 + $0xa0] sm:$0xff] }
  0x29   :  { %v242_v8 = vpack.c.bf16 %v64_v6, %v63_v5  ;;  %v48_v10 = vld [vmem:[#allocation5 + $0x18] sm:$0xff]  ;;  %239 = vmatprep.subr.bf16.mxu0 %v238_v3  ;;  %v66_v12 = vld [vmem:[#allocation5 + $0xa8] sm:$0xff]  ;;  %v49_v15 = vld [vmem:[#allocation5 + $0x20] sm:$0xff] }
  0x2a   :  { %241 = vmatpush3.bf16.msra.mxu0 %v240_v7  ;;  %v244_v13 = vpack.c.bf16 %v48_v10, %v47_v9  ;;  %v246_v14 = vpack.c.bf16 %v66_v12, %v65_v11  ;;  %v50_v16 = vld [vmem:[#allocation5 + $0x28] sm:$0xff]  ;;  %v67_v17 = vld [vmem:[#allocation5 + $0xb0] sm:$0xff]  ;;  %v68_v18 = vld [vmem:[#allocation5 + $0xb8] sm:$0xff] }
  0x2b   :  { %243 = vmatprep.subr.bf16.mxu0 %v242_v8  ;;  %v248_v19 = vpack.c.bf16 %v50_v16, %v49_v15  ;;  %v250_v20 = vpack.c.bf16 %v68_v18, %v67_v17  ;;  %v51_v21 = vld [vmem:[#allocation5 + $0x30] sm:$0xff]  ;;  %v52_v22 = vld [vmem:[#allocation5 + $0x38] sm:$0xff]  ;;  %v69_v23 = vld [vmem:[#allocation5 + $0xc0] sm:$0xff] }
  0x2c   :  { %v70_v24 = vld [vmem:[#allocation5 + $0xc8] sm:$0xff]  ;;  %v202_v25 = vld.sshfl [vmem:[#allocation2] sm:$0x33 pattern:$0x76325410]  ;;  %v252_v27 = vpack.c.bf16 %v52_v22, %v51_v21  ;;  %v53_v29 = vld [vmem:[#allocation5 + $0x40] sm:$0xff] }
  0x2d   :  { %v92_v26 = vcombine.high %v202_v25, %v202_v25  ;;  %v254_v28 = vpack.c.bf16 %v70_v24, %v69_v23  ;;  %v54_v30 = vld [vmem:[#allocation5 + $0x48] sm:$0xff]  ;;  %v71_v31 = vld [vmem:[#allocation5 + $0xd0] sm:$0xff]  ;;  %v72_v32 = vld [vmem:[#allocation5 + $0xd8] sm:$0xff] }
  0x2e   :  { %245 = vmatpush3.bf16.msra.mxu0 %v244_v13  ;;  %v256_v33 = vpack.c.bf16 %v54_v30, %v53_v29  ;;  %v258_v34 = vpack.c.bf16 %v72_v32, %v71_v31  ;;  %v55_v35 = vld [vmem:[#allocation5 + $0x50] sm:$0xff]  ;;  %v56_v36 = vld [vmem:[#allocation5 + $0x58] sm:$0xff]  ;;  %v73_v37 = vld [vmem:[#allocation5 + $0xe0] sm:$0xff] }
  0x2f   :  { %247 = vmatprep.subr.bf16.mxu0 %v246_v14  ;;  %159 = vmatprep.mubr.f32.mxu0 %v92_v26  ;;  %v74_v38 = vld [vmem:[#allocation5 + $0xe8] sm:$0xff]  ;;  %v260_v39 = vpack.c.bf16 %v56_v36, %v55_v35  ;;  %v57_v41 = vld [vmem:[#allocation5 + $0x60] sm:$0xff]  ;;  %v75_v43 = vld [vmem:[#allocation5 + $0xf0] sm:$0xff] }
  0x30   :  { %v262_v40 = vpack.c.bf16 %v74_v38, %v73_v37  ;;  %v58_v42 = vld [vmem:[#allocation5 + $0x68] sm:$0xff]  ;;  %v76_v44 = vld [vmem:[#allocation5 + $0xf8] sm:$0xff]  ;;  %v59_v47 = vld [vmem:[#allocation5 + $0x70] sm:$0xff] }
  0x31   :  { %v264_v45 = vpack.c.bf16 %v58_v42, %v57_v41  ;;  %v266_v46 = vpack.c.bf16 %v76_v44, %v75_v43  ;;  %v60_v48 = vld [vmem:[#allocation5 + $0x78] sm:$0xff] }
  0x32   :  { %249 = vmatpush3.bf16.msra.mxu0 %v248_v19  ;;  %v268_v49 = vpack.c.bf16 %v60_v48, %v59_v47  ;;  %v201_v51 = vld [vmem:[%s432_s2] ss:$0 sm:$0xff]  ;;  %s355_s2 = smov [#allocation7]  }
  0x33   :  { %251 = vmatprep.subr.bf16.mxu0 %v250_v20  ;;  %v165_v60 = vld [vmem:[%s433_s3] sm:$0x1]  ;;  %s191_s17 = sshll.u32 %s355_s2, 4  ;;  %s192_s17 = int_to_ptr.vmem [resolvable:$true] %s191_s17 }
  0x34   :  { %v166_v62 = vunpack.c.l.bf16 %v165_v60  ;;  %s323_s18 = scalar_lea.vmem %s192_s17, 32  ;;  %p328_p3 = scmp.lt.s32.totalorder %s192_s17, %s192_s17 }
  0x35   :  { %p324_p2 = scmp.ne.s32.totalorder %s192_s17, %s323_s18  ;;  %p329_p4 = scmp.lt.s32.totalorder %s323_s18, %s323_s18 }
  0x36   :  { %253 = vmatpush3.bf16.msra.mxu0 %v252_v27 }
  0x37   :  { %255 = vmatprep.subr.bf16.mxu0 %v254_v28  ;;  %p330_p5 = por %p329_p4, %p328_p3 }
  0x39   :  { %p331_p6 = pnand %p330_p5, %p324_p2 }
  0x3a   :  { %257 = vmatpush3.bf16.msra.mxu0 %v256_v33 }
  0x3b   :  { %259 = vmatprep.subr.bf16.mxu0 %v258_v34 }
  0x3e   :  { %261 = vmatpush3.bf16.msra.mxu0 %v260_v39 }
  0x3f   :  { %263 = vmatprep.subr.bf16.mxu0 %v262_v40 }
  0x42   :  { %265 = vmatpush3.bf16.msra.mxu0 %v264_v45 }
  0x43   :  { %267 = vmatprep.subr.bf16.mxu0 %v266_v46 }
  0x46   :  { %269 = vmatpush3.bf16.msra.mxu0 %v268_v49 }
  0x49   :  { %160 = vmatmul.mubr.f32.vlgmr.msra.gmra.mrb[0].mxu0 %v202_v25 }
 0x11c   :  { %v235_v50 = vpop.f32.mrb[0].mxu0 }
 0x11d   :  { %v236_v52 = vpop.f32.mrb[1].mxu0 }
 0x11e   :  { %v237_v53 = vadd.f32 %v236_v52, %v235_v50 }
 0x120   :  { %v162_v54 = vadd.f32 %v237_v53, %v201_v51 }
 0x122   :  { %v170_v55 = vand.u32 2147483647, %v162_v54  ;;  %v167_v0 = vmax.f32 %v162_v54, 0.0  ;;  %v168_v1 = vmul.f32 %v166_v62, %v162_v54 }
 0x124   :  { %v171_v56 = vsub.f32 0.0, %v170_v55  ;;  %v169_v6 = vsub.f32 %v167_v0, %v168_v1 }
 0x126   :  { %v172_v57 = vmul.f32 1.442695, %v171_v56 }
 0x128   :  { %275 = vpow2.f32 %v172_v57 }
 0x132   :  { %v276_v58 = vpop.eup %275 }
 0x133   :  { %v174_v59 = vadd.f32 1.0, %v276_v58  ;;  %v177_v61 = vmul.f32 -0.5, %v276_v58  ;;  %v180_v2 = vand.u32 2147483647, %v276_v58 }
 0x135   :  { %277 = vlog2.f32 %v174_v59  ;;  %v178_v63 = vadd.f32 1.0, %v177_v61  ;;  %vm181_vm0 = vcmp.lt.f32.partialorder %v180_v2, 0.0004427343 }
 0x137   :  { %v179_v5 = vmul.f32 %v276_v58, %v178_v63 }
 0x13f   :  { %v278_v3 = vpop.eup %277 }
 0x140   :  { %v176_v4 = vmul.f32 0.6931472, %v278_v3 }
 0x142   :  { %v182_v7 = vsel %vm181_vm0, %v179_v5, %v176_v4 }
 0x143   :  { %v183_v8 = vadd.f32 %v182_v7, %v169_v6 }
 0x145   :  { %184 = vst [vmem:[#allocation7] sm:$0x3] %v183_v8 }
 0x146   :  { %334 = shalt.err (!%p331_p6)
}
 0x147   :  { %s335_s20 = scalar_lea.hbm %s434_s4, 32 }
 0x148   :  { %p336_p7 = scmp.ne.s32.totalorder %s434_s4, %s335_s20  ;;  %p339_p8 = scmp.lt.u32.totalorder %s335_s20, %s434_s4 }
 0x14a   :  { %p341_p9 = pnand %p339_p8, %p336_p7 }
 0x14c   :  { %344 = shalt.err (!%p341_p9)
}
 0x14d   :  { %194 = dma.vmem_to_hbm [thread:$0]  %s192_s17, 32, %s434_s4, [#allocation4]  }
 0x14e   :  { %349 = dma.done.wait [#allocation4], 32  }
 0x14f   :  { %350 = vsyncadd [#allocation4], 4294967264 }
 0x150   :  { %198 = vsyncpa [#allocation3], 1 }
 0x151   :  { %199 = vsyncpa [#allocation6], 1 }
 0x152   :  { %200 = vsyncpa [#allocation4], 1 }

</bundles_post_ra>
